<compile_context>
chip_gen: v7x
topology: tpu7x:2x2x1
jax: 0.10.0
libtpu: 0.0.40
codegen_flags: <defaults>
</compile_context>

<pallas_src>
import functools

import jax
import jax.numpy as jnp
from jax.experimental import pallas as pl
from jax.experimental.pallas import tpu as pltpu


# -----------------------------------------------------------------------------
# Kernel: fused 3x3 conv (pad=1, stride=1) + folded BN bias + ReLU
# -----------------------------------------------------------------------------
def _conv_bn_relu_kernel(top_ref, mid_ref, bot_ref, w_ref, b_ref, o_ref):
    # top_ref: (1, 1,  Wp, Cin)   row just above the tile (clamped at border)
    # mid_ref: (1, TH, Wp, Cin)   tile body; width already zero-padded (col 0
    #                             and cols >= W+1 are zeros)
    # bot_ref: (1, 1,  Wp, Cin)   row just below the tile (clamped at border)
    # w_ref  : (9*Cin, Cout_p)    bf16, BN scale folded in, K-order (dy, dx, c)
    # b_ref  : (1, Cout_p)        f32 folded bias
    # o_ref  : (1, TH, W, Cout_p) bf16 (or f32)
    i = pl.program_id(1)
    n = pl.num_programs(1)

    _, TH, Wp, Cin = mid_ref.shape
    W = o_ref.shape[2]
    Cout = o_ref.shape[3]

    # Cast on the VPU (no-op if the input is already bf16).
    mid = mid_ref[0].astype(jnp.bfloat16)                 # (TH, Wp, Cin)
    top = top_ref[0].astype(jnp.bfloat16)                 # (1,  Wp, Cin)
    bot = bot_ref[0].astype(jnp.bfloat16)                 # (1,  Wp, Cin)

    # Zero the halo rows at the image border.  jnp.where (not multiply) so a
    # NaN/Inf in the clamped border row cannot leak into the masked halo.
    top = jnp.where(i > 0, top, jnp.zeros_like(top))
    bot = jnp.where(i < n - 1, bot, jnp.zeros_like(bot))

    xt = jnp.concatenate([top, mid, bot], axis=0)         # (TH+2, Wp, Cin)

    # dx im2col, hoisted: ONE lane concat shared by all three dy taps.
    xcat = jnp.concatenate(
        [xt[:, 0:W], xt[:, 1:W + 1], xt[:, 2:W + 2]], axis=-1)   # (TH+2, W, 3*Cin)

    if Cin <= 64:
        # Fold dy as well -> single matmul with K = 9*Cin; per-tap accumulation
        # lives in the MXU (no f32 zeros + VALU adds).
        patch = jnp.concatenate(
            [xcat[0:TH], xcat[1:TH + 1], xcat[2:TH + 2]], axis=-1)  # (TH, W, 9*Cin)
        acc = jnp.dot(patch.reshape(TH * W, 9 * Cin), w_ref[...],
                      preferred_element_type=jnp.float32)
    else:
        # Wide channels already saturate the MXU at K = 3*Cin; use the first
        # dot as the accumulator (no zeros-init).
        # TODO(synk): for Cin >= 128 switch to pltpu.roll dx-shifts (9 matmuls,
        #             no im2col lane concat at all).
        acc = None
        for dy in range(3):
            p = xcat[dy:dy + TH].reshape(TH * W, 3 * Cin)
            d = jnp.dot(p, w_ref[pl.ds(dy * 3 * Cin, 3 * Cin), :],
                        preferred_element_type=jnp.float32)
            acc = d if acc is None else acc + d

    # Epilogue: bias + ReLU in f32 (BN scale already folded into w).
    y = jnp.maximum(acc + b_ref[...], 0.0)
    o_ref[0] = y.reshape(TH, W, Cout).astype(o_ref.dtype)


# -----------------------------------------------------------------------------
# Tile / VMEM sizing (generation-aware)
# -----------------------------------------------------------------------------
def _vmem_budget():
    """Returns (compiler vmem limit bytes, per-grid-step live-byte target)."""
    try:
        cap = int(pltpu.get_tpu_info().vmem_capacity_bytes)
    except Exception:
        cap = 64 * 1024 * 1024          # conservative fallback (v7x per-TC VMEM)
    limit = min((cap * 3) // 4, 64 * 1024 * 1024)   # up to 64 MiB on 128 MiB parts
    if cap <= 64 * 1024 * 1024:                      # v7x: stay well under 64 MiB
        limit = min(limit, 48 * 1024 * 1024)
    step = max(2 * 1024 * 1024, limit // 6)
    return int(limit), int(step)


def _pick_tile_rows(B, H, W, Wp, cin, cout_p, out_itemsize, step_budget):
    """Largest row tile whose per-step live set fits the budget.

    Counts the double-buffered input/output blocks plus the in-kernel
    temporaries (xt, the hoisted 3*Cin im2col, the 9*Cin patch, f32 acc/ReLU).
    """
    per_row = (2 * Wp * cin * 2                     # input body block (bf16) x2 buffers
               + 2 * W * cout_p * out_itemsize      # output block x2 buffers
               + Wp * cin * 2                       # xt (bf16)
               + W * 3 * cin * 2                    # xcat (bf16)
               + W * 9 * cin * 2                    # patch (bf16)
               + 2 * W * cout_p * 4)                # acc + ReLU result (f32)
    fixed = (9 * cin * cout_p * 2                   # resident folded weights (bf16)
             + 8 * Wp * cin * 2)                    # two 1-row halos, double-buffered
    th = max(1, (step_budget - fixed) // max(per_row, 1))
    th = int(min(th, H))
    if B == 1 and H > 1:
        th = min(th, -(-H // 2))   # >= 2 row tiles so both v7x TensorCores get work
    return th


# -----------------------------------------------------------------------------
# Wrapper
# -----------------------------------------------------------------------------
def bottom_conv_forward(x, params, *, eps=1e-5, tile_rows=None,
                        out_dtype=jnp.bfloat16, keep_padded_channels=False):
    """BottomConv forward.

    x: (B, H, W, Cin) NHWC.  params: dict with
       w (3,3,Cin,Cout), conv_bias, gamma, beta, running_mean, running_var (Cout,).
    Returns (B, H, W, Cout) in `out_dtype` (bf16 by default).  Pass
    keep_padded_channels=True to skip the Cout slice and hand the lane-padded
    tensor straight to the next (bf16) UNet layer.
    """
    B, H, W, Cin = x.shape
    w = params["w"]
    Cout = w.shape[-1]

    # --- fold eval-mode BatchNorm into the conv (scale -> weights, rest -> bias)
    scale = params["gamma"] * jax.lax.rsqrt(params["running_var"] + eps)   # (Cout,)
    w_f = (w.astype(jnp.float32) * scale).astype(jnp.bfloat16)             # (3,3,Cin,Cout)
    b_f = (params["beta"]
           + (params["conv_bias"] - params["running_mean"]) * scale
           ).astype(jnp.float32)                                           # (Cout,)

    # --- lane-dense output channels: pad Cout to a multiple of 128 only if needed
    cout_p = -(-Cout // 128) * 128
    if cout_p != Cout:
        w_f = jnp.pad(w_f, ((0, 0), (0, 0), (0, 0), (0, cout_p - Cout)))
        b_f = jnp.pad(b_f, ((0, cout_p - Cout),))
    w_r = w_f.reshape(9 * Cin, cout_p)          # K index order = (dy, dx, cin)
    b_r = b_f.reshape(1, cout_p)

    out_itemsize = jnp.dtype(out_dtype).itemsize
    vmem_limit, step_budget = _vmem_budget()

    # width pre-pad: +1 zero column each side, rounded up to a sublane multiple
    Wp = max(W + 2, -(-(W + 2) // 8) * 8)

    if tile_rows is not None:
        TH = int(min(tile_rows, H))
    else:
        TH = _pick_tile_rows(B, H, W, Wp, Cin, cout_p, out_itemsize, step_budget)

    Hp = -(-H // TH) * TH                       # pad H instead of shrinking TH
    n_tiles = Hp // TH

    # One fused HBM pass: zero-pad W (and H remainder) + cast to bf16.
    xp = jnp.pad(x, ((0, 0), (0, Hp - H), (1, Wp - W - 1), (0, 0))
                 ).astype(jnp.bfloat16)

    out = pl.pallas_call(
        _conv_bn_relu_kernel,
        out_shape=jax.ShapeDtypeStruct((B, Hp, W, cout_p), out_dtype),
        grid=(B, n_tiles),
        in_specs=[
            # 1-row halo above the tile.  NOTE: the row offsets below are
            # element-level; they coincide with block indices only because the
            # halo block height is 1 -- keep it 1.
            pl.BlockSpec((1, 1, Wp, Cin),
                         lambda b, i: (b, jnp.maximum(i * TH - 1, 0), 0, 0)),
            # tile body
            pl.BlockSpec((1, TH, Wp, Cin), lambda b, i: (b, i, 0, 0)),
            # 1-row halo below the tile
            pl.BlockSpec((1, 1, Wp, Cin),
                         lambda b, i: (b, jnp.minimum(i * TH + TH, Hp - 1), 0, 0)),
            # weights / bias stay resident (constant index_map)
            pl.BlockSpec((9 * Cin, cout_p), lambda b, i: (0, 0)),
            pl.BlockSpec((1, cout_p), lambda b, i: (0, 0)),
        ],
        out_specs=pl.BlockSpec((1, TH, W, cout_p), lambda b, i: (b, i, 0, 0)),
        compiler_params=pltpu.CompilerParams(
            dimension_semantics=("parallel", "parallel"),
            vmem_limit_bytes=vmem_limit,
        ),
    )(xp, xp, xp, w_r, b_r)

    if Hp != H:
        out = out[:, :H]
    if cout_p != Cout and not keep_padded_channels:
        out = out[..., :Cout]
    return out


# -----------------------------------------------------------------------------
# Deterministic parameter init (shapes from BottomConv.__init__)
# -----------------------------------------------------------------------------
def init_params(key, cin, cout):
    kw, kb, kg, kbe, km, kv = jax.random.split(key, 6)
    return dict(
        w=jax.random.normal(kw, (3, 3, cin, cout), jnp.float32) / jnp.sqrt(9.0 * cin),
        conv_bias=0.05 * jax.random.normal(kb, (cout,), jnp.float32),
        gamma=1.0 + 0.1 * jax.random.normal(kg, (cout,), jnp.float32),
        beta=0.1 * jax.random.normal(kbe, (cout,), jnp.float32),
        running_mean=0.1 * jax.random.normal(km, (cout,), jnp.float32),
        running_var=1.0 + 0.1 * jnp.abs(jax.random.normal(kv, (cout,), jnp.float32)),
    )


def _reference(x, params, eps=1e-5):
    """Pure-JAX reference on the same bf16-rounded operands."""
    scale = params["gamma"] / jnp.sqrt(params["running_var"] + eps)
    w_f = (params["w"] * scale).astype(jnp.bfloat16).astype(jnp.float32)
    b_f = params["beta"] + (params["conv_bias"] - params["running_mean"]) * scale
    xb = x.astype(jnp.bfloat16).astype(jnp.float32)
    y = jax.lax.conv_general_dilated(
        xb, w_f, window_strides=(1, 1), padding="SAME",
        dimension_numbers=("NHWC", "HWIO", "NHWC"))
    return jnp.maximum(y + b_f, 0.0)


# -----------------------------------------------------------------------------
if __name__ == "__main__":
    key = jax.random.PRNGKey(0)
    B, H, W, Cin, Cout = 2, 16, 16, 32, 64

    k_x, k_p = jax.random.split(key)
    x = jax.random.normal(k_x, (B, H, W, Cin), jnp.float32)
    params = init_params(k_p, Cin, Cout)

    # tile_rows=8 -> grid (B, 2): exercises the multi-tile halo path.
    fwd = jax.jit(functools.partial(bottom_conv_forward, tile_rows=8))
    out = jax.block_until_ready(fwd(x, params))

    assert out.shape == (B, H, W, Cout), out.shape
    assert out.dtype == jnp.bfloat16, out.dtype
    out_f32 = out.astype(jnp.float32)
    assert bool(jnp.all(jnp.isfinite(out_f32)))

    ref = _reference(x, params)
    max_err = float(jnp.max(jnp.abs(out_f32 - ref)))
    assert max_err < 5e-2, f"max_err={max_err}"

    print("KERNEL_OK")
</pallas_src>

<mosaic_0001>
module attributes {stable_mosaic.version = 11 : i64} {
  func.func @_conv_bn_relu_kernel(%arg0: i32, %arg1: i32, %arg2: memref<1x1x24x32xbf16, #tpu.memory_space<vmem>>, %arg3: memref<1x8x24x32xbf16, #tpu.memory_space<vmem>>, %arg4: memref<1x1x24x32xbf16, #tpu.memory_space<vmem>>, %arg5: memref<288x128xbf16, #tpu.memory_space<vmem>>, %arg6: memref<1x128xf32, #tpu.memory_space<vmem>>, %arg7: memref<1x8x16x128xbf16, #tpu.memory_space<vmem>>) attributes {dimension_semantics = [#tpu.dimension_semantics<parallel>, #tpu.dimension_semantics<parallel>], iteration_bounds = array<i64: 2, 2>, scalar_prefetch = 0 : i64, scratch_operands = 0 : i64, tpu.core_type = #tpu.core_type<tc>, window_params = [{transform_indices = @transform_0, window_bounds = array<i64: 1, 1, 24, 32>}, {transform_indices = @transform_1, window_bounds = array<i64: 1, 8, 24, 32>}, {transform_indices = @transform_2, window_bounds = array<i64: 1, 1, 24, 32>}, {pipeline_mode = #tpu.pipeline_mode<synchronous>, transform_indices = @transform_3, window_bounds = array<i64: 288, 128>}, {pipeline_mode = #tpu.pipeline_mode<synchronous>, transform_indices = @transform_4, window_bounds = array<i64: 1, 128>}, {transform_indices = @transform_5, window_bounds = array<i64: 1, 8, 16, 128>}]} {
    %c0 = arith.constant 0 : index
    %c0_0 = arith.constant 0 : index
    %c0_1 = arith.constant 0 : index
    %c0_2 = arith.constant 0 : index
    %0 = vector.load %arg3[%c0, %c0_0, %c0_1, %c0_2] : memref<1x8x24x32xbf16, #tpu.memory_space<vmem>>, vector<1x8x24x32xbf16>
    %1 = vector.shape_cast %0 : vector<1x8x24x32xbf16> to vector<8x24x32xbf16>
    %c0_3 = arith.constant 0 : index
    %c0_4 = arith.constant 0 : index
    %c0_5 = arith.constant 0 : index
    %c0_6 = arith.constant 0 : index
    %2 = vector.load %arg2[%c0_3, %c0_4, %c0_5, %c0_6] : memref<1x1x24x32xbf16, #tpu.memory_space<vmem>>, vector<1x1x24x32xbf16>
    %3 = vector.shape_cast %2 : vector<1x1x24x32xbf16> to vector<1x24x32xbf16>
    %c0_7 = arith.constant 0 : index
    %c0_8 = arith.constant 0 : index
    %c0_9 = arith.constant 0 : index
    %c0_10 = arith.constant 0 : index
    %4 = vector.load %arg4[%c0_7, %c0_8, %c0_9, %c0_10] : memref<1x1x24x32xbf16, #tpu.memory_space<vmem>>, vector<1x1x24x32xbf16>
    %5 = vector.shape_cast %4 : vector<1x1x24x32xbf16> to vector<1x24x32xbf16>
    %c0_i32 = arith.constant 0 : i32
    %6 = arith.cmpi sgt, %arg1, %c0_i32 : i32
    %cst = arith.constant 0.000000e+00 : bf16
    %7 = vector.broadcast %cst : bf16 to vector<1x24x32xbf16>
    %8 = arith.select %6, %3, %7 : vector<1x24x32xbf16>
    %c1_i32 = arith.constant 1 : i32
    %9 = arith.cmpi slt, %arg1, %c1_i32 : i32
    %cst_11 = arith.constant 0.000000e+00 : bf16
    %10 = vector.broadcast %cst_11 : bf16 to vector<1x24x32xbf16>
    %11 = arith.select %9, %5, %10 : vector<1x24x32xbf16>
    %12 = tpu.concatenate %8, %1, %11 in 0 : vector<1x24x32xbf16>, vector<8x24x32xbf16>, vector<1x24x32xbf16> -> vector<10x24x32xbf16>
    %13 = vector.extract_strided_slice %12 {offsets = [0, 0, 0], sizes = [10, 16, 32], strides = [1, 1, 1]} : vector<10x24x32xbf16> to vector<10x16x32xbf16>
    %14 = vector.extract_strided_slice %12 {offsets = [0, 1, 0], sizes = [10, 16, 32], strides = [1, 1, 1]} : vector<10x24x32xbf16> to vector<10x16x32xbf16>
    %15 = vector.extract_strided_slice %12 {offsets = [0, 2, 0], sizes = [10, 16, 32], strides = [1, 1, 1]} : vector<10x24x32xbf16> to vector<10x16x32xbf16>
    %16 = tpu.concatenate %13, %14, %15 in 2 : vector<10x16x32xbf16>, vector<10x16x32xbf16>, vector<10x16x32xbf16> -> vector<10x16x96xbf16>
    %17 = vector.extract_strided_slice %16 {offsets = [0, 0, 0], sizes = [8, 16, 96], strides = [1, 1, 1]} : vector<10x16x96xbf16> to vector<8x16x96xbf16>
    %18 = vector.extract_strided_slice %16 {offsets = [1, 0, 0], sizes = [8, 16, 96], strides = [1, 1, 1]} : vector<10x16x96xbf16> to vector<8x16x96xbf16>
    %19 = vector.extract_strided_slice %16 {offsets = [2, 0, 0], sizes = [8, 16, 96], strides = [1, 1, 1]} : vector<10x16x96xbf16> to vector<8x16x96xbf16>
    %20 = tpu.concatenate %17, %18, %19 in 2 : vector<8x16x96xbf16>, vector<8x16x96xbf16>, vector<8x16x96xbf16> -> vector<8x16x288xbf16>
    %21 = vector.shape_cast %20 : vector<8x16x288xbf16> to vector<128x288xbf16>
    %c0_12 = arith.constant 0 : index
    %c0_13 = arith.constant 0 : index
    %22 = vector.load %arg5[%c0_12, %c0_13] : memref<288x128xbf16, #tpu.memory_space<vmem>>, vector<288x128xbf16>
    %cst_14 = arith.constant dense<0.000000e+00> : vector<128x128xf32>
    %23 = tpu.matmul %21, %22, %cst_14 {dimension_numbers = #tpu.dot_dimension_numbers<[1], [0], [0], [1], [0, 0, 1, 1], [], []>} : vector<128x288xbf16>, vector<288x128xbf16>, vector<128x128xf32> -> vector<128x128xf32>
    %c0_15 = arith.constant 0 : index
    %c0_16 = arith.constant 0 : index
    %24 = vector.load %arg6[%c0_15, %c0_16] : memref<1x128xf32, #tpu.memory_space<vmem>>, vector<1x128xf32>
    %25 = vector.broadcast %24 : vector<1x128xf32> to vector<128x128xf32>
    %26 = arith.addf %23, %25 : vector<128x128xf32>
    %cst_17 = arith.constant 0.000000e+00 : f32
    %27 = vector.broadcast %cst_17 : f32 to vector<128x128xf32>
    %28 = arith.maximumf %26, %27 : vector<128x128xf32>
    %29 = vector.shape_cast %28 : vector<128x128xf32> to vector<8x16x128xf32>
    %30 = arith.truncf %29 : vector<8x16x128xf32> to vector<8x16x128xbf16>
    %c0_18 = arith.constant 0 : index
    %c0_19 = arith.constant 0 : index
    %c0_20 = arith.constant 0 : index
    %c0_21 = arith.constant 0 : index
    %31 = vector.load %arg7[%c0_18, %c0_19, %c0_20, %c0_21] : memref<1x8x16x128xbf16, #tpu.memory_space<vmem>>, vector<1x8x16x128xbf16>
    %32 = vector.shape_cast %31 : vector<1x8x16x128xbf16> to vector<8x16x128xbf16>
    %33 = vector.shape_cast %30 : vector<8x16x128xbf16> to vector<1x8x16x128xbf16>
    tpu.vector_store %arg7[%c0_18, %c0_19, %c0_20, %c0_21], %33 {strides = array<i32>} : memref<1x8x16x128xbf16, #tpu.memory_space<vmem>>, vector<1x8x16x128xbf16>,
    return
  }
  func.func @transform_0(%arg0: i32, %arg1: i32) -> (i32, i32, i32, i32) {
    %c8_i32 = arith.constant 8 : i32
    %0 = arith.muli %arg1, %c8_i32 : i32
    %c1_i32 = arith.constant 1 : i32
    %1 = arith.subi %0, %c1_i32 : i32
    %c0_i32 = arith.constant 0 : i32
    %2 = arith.maxsi %1, %c0_i32 : i32
    %c0_i32_0 = arith.constant 0 : i32
    %c0_i32_1 = arith.constant 0 : i32
    %c0_i32_2 = arith.constant 0 : i32
    return %arg0, %2, %c0_i32_0, %c0_i32_1 : i32, i32, i32, i32
  }
  func.func @transform_1(%arg0: i32, %arg1: i32) -> (i32, i32, i32, i32) {
    %c0_i32 = arith.constant 0 : i32
    %c0_i32_0 = arith.constant 0 : i32
    %c0_i32_1 = arith.constant 0 : i32
    return %arg0, %arg1, %c0_i32, %c0_i32_0 : i32, i32, i32, i32
  }
  func.func @transform_2(%arg0: i32, %arg1: i32) -> (i32, i32, i32, i32) {
    %c8_i32 = arith.constant 8 : i32
    %0 = arith.muli %arg1, %c8_i32 : i32
    %c8_i32_0 = arith.constant 8 : i32
    %1 = arith.addi %0, %c8_i32_0 : i32
    %c15_i32 = arith.constant 15 : i32
    %2 = arith.minsi %1, %c15_i32 : i32
    %c0_i32 = arith.constant 0 : i32
    %c0_i32_1 = arith.constant 0 : i32
    %c0_i32_2 = arith.constant 0 : i32
    return %arg0, %2, %c0_i32, %c0_i32_1 : i32, i32, i32, i32
  }
  func.func @transform_3(%arg0: i32, %arg1: i32) -> (i32, i32) {
    %c0_i32 = arith.constant 0 : i32
    %c0_i32_0 = arith.constant 0 : i32
    %c0_i32_1 = arith.constant 0 : i32
    return %c0_i32, %c0_i32_0 : i32, i32
  }
  func.func @transform_4(%arg0: i32, %arg1: i32) -> (i32, i32) {
    %c0_i32 = arith.constant 0 : i32
    %c0_i32_0 = arith.constant 0 : i32
    %c0_i32_1 = arith.constant 0 : i32
    return %c0_i32, %c0_i32_0 : i32, i32
  }
  func.func @transform_5(%arg0: i32, %arg1: i32) -> (i32, i32, i32, i32) {
    %c0_i32 = arith.constant 0 : i32
    %c0_i32_0 = arith.constant 0 : i32
    %c0_i32_1 = arith.constant 0 : i32
    return %arg0, %arg1, %c0_i32, %c0_i32_0 : i32, i32, i32, i32
  }
}

</mosaic_0001>

<bundles_post_ra>
// kernel: bottom_conv_forward.1
= control target key start
LH: loop header
LB: loop body
LE: loop exit
PB: predicated region body
PF: predicated region fallthrough
CT: control target
= control target key end

     0   :  { %10 = vsyncpa [#allocation3], 0  ;;  %s2453_s0 = inlined_call_operand.vmem [shape: bf16[2,16,24,32], index: 0, kind: input, shape index: {}, may-alias: {0,1,2}]   ;;  %s2454_s1 = inlined_call_operand.vmem [shape: bf16[2,16,24,32], index: 1, kind: input, shape index: {}, may-alias: {0,1,2}]   ;;  %s2455_s2 = inlined_call_operand.vmem [shape: bf16[2,16,24,32], index: 2, kind: input, shape index: {}, may-alias: {0,1,2}]   ;;  %s2456_s3 = inlined_call_operand.vmem [shape: bf16[288,128], index: 3, kind: input, shape index: {}]   ;;  %s2457_s4 = inlined_call_operand.vmem [shape: f32[1,128], index: 4, kind: input, shape index: {}]   ;;  %s2458_s5 = inlined_call_operand.hbm [shape: bf16[2,16,16,128], index: 5, kind: output, shape index: {}]  }
   0x1   :  { %12 = vsyncpa [#allocation3 + $0x1], 0  ;;  %s1948_s18 = smov 0   ;;  %s1950_s19 = smov 0  }
   0x2   :  { %s1952_s20 = smov 0   ;;  %s1954_s21 = smov 0  }
   0x3   :  { %s1956_s22 = smov 0   ;;  %s1958_s23 = smov 0  }
   0x4   :  { %s1960_s24 = smov 0   ;;  %s1962_s25 = smov 0  }
   0x5 LB: > { %s1431_s26 = sadd.s32 4294967295, %s1911_s25   ;;  %s1432_s27 = sadd.s32 4294967294, %s1911_s25   ;;  %s1911_s25 = sphi %s1962_s25, %s18_s25   ;;  %s1907_s24 = sphi %s1960_s24, %s2471_s24   ;;  %s1903_s23 = sphi %s1958_s23, %s2470_s23   ;;  %s1899_s22 = sphi %s1956_s22, %s2469_s22   ;;  %s1895_s21 = sphi %s1954_s21, %s2468_s21   ;;  %s1891_s20 = sphi %s1952_s20, %s2467_s20   ;;  %s1887_s19 = sphi %s1950_s19, %s2466_s19   ;;  %s1883_s18 = sphi %s1948_s18, %s2465_s18  }
   0x6   : > { %s27_s28 = sadd.s32 1, %s1903_s23  ;;  %s30_s29 = sadd.s32 1, %s1907_s24 }
   0x7   : > { %p28_p0 = scmp.ge.s32.totalorder %s27_s28, 2  ;;  %p191_p1 = scmp.ne.s32.totalorder %s1891_s20, %s1887_s19 }
   0x8   : > { %p192_p2 = scmp.eq.s32.totalorder %s1431_s26, 3  ;;  %p197_p5 = scmp.ne.s32.totalorder %s1887_s19, %s1883_s18 }
   0x9   : > { %s2473_s28 = smov (%p28_p0, %s27_s28), 0  ;;  %s2475_s29 = smov (!%p28_p0, %s30_s29), %s1907_s24 }
   0xa   : > { %s177_s30 = ssub.s32 %s1903_s23, %s2473_s28  ;;  %p1999_p3 = por %p192_p2, %p191_p1 }
   0xb   : > { %p32_p4 = scmp.ge.s32.totalorder %s2475_s29, 2  ;;  %p198_p6 = scmp.eq.s32.totalorder %s1432_s27, 3 }
   0xc   : > { %p1441_p7 = scmp.ge.s32.totalorder %s1911_s25, 1  ;;  %p276_p9 = scmp.lt.s32.totalorder %s1911_s25, 5 }
   0xd   : > { %s2477_s29 = smov (%p32_p4, %s2475_s29), 0  ;;  %p2008_p8 = por %p198_p6, %p197_p5 }
   0xe   : > { %2461 = sst [smem:[#allocation5_spill]] %s2477_s29  ;;  %s176_s8 = ssub.s32 %s1907_s24, %s2477_s29 }
   0xf   : > { %s181_s9 = sadd.s32 1, %s1891_s20  ;;  %s178_s10 = sor.u32 %s177_s30, %s176_s8 }
  0x10   : > { %p277_p10 = pnand %p1441_p7, %p276_p9  ;;  %p179_p11 = scmp.eq.s32.totalorder %s178_s10, 0 }
  0x11   : > { %s1443_s12 = sshll.u32 (!%p277_p10), %s1895_s21, 3  ;;  %p339_p12 = scmp.lt.s32.totalorder (!%p277_p10), %s1899_s22, 1  ;;  %vm647_vm0 = vcmask (!%p277_p10), 1046528   ;;  %vm506_vm1 = vsmask.f32 (!%p277_p10), 7424  ;;  %vm698_vm4 = vcmask (!%p277_p10), 261120  }
  0x12   : > { %s2017_s11 = scalar_select %p179_p11, %s1891_s20, %s181_s9  }
  0x13   : > { %280 = sbr.rel (%p277_p10) target bundleno = 561 (0x231), region = 40  ;;  %p355_p13 = scmp.lt.s32.totalorder (!%p277_p10), %s1443_s12, 15  ;;  %vm719_vm5 = vcmask (!%p277_p10), 523264   ;;  %vm781_vm6 = vcmask (!%p277_p10), 785408  }
  0x14   : > { %s364_s17 = sadd.s32 (!%p277_p10), 8, %s1443_s12  ;;  %s2029_s8 = sadd.s32 (!%p277_p10), 4294967295, %s1443_s12 }
  0x15   : > { %p2025_p0 = scmp.lt.s32.totalorder (!%p277_p10), %s364_s17, 15  ;;  %p419_p1 = scmp.lt.s32.totalorder (!%p277_p10), %s1895_s21, 1 }
  0x16   : > { %p337_p2 = scmp.gt.s32.totalorder (!%p277_p10), %s2029_s8, 0  ;;  %p1445_p4 = scmp.lt.s32.totalorder (!%p277_p10), %s2029_s8, 15 }
  0x17   : > { %p412_p5 = scmp.gt.s32.totalorder (!%p277_p10), %s1895_s21, 0 }
  0x1a   : > { %s340_s13 = scalar_select %p339_p12, %s1899_s22, 1 }
  0x1b   : > { %s356_s14 = scalar_select %p355_p13, %s1443_s12, 15 }
  0x1c   : > { %s2022_s15 = smul.u32 48, %s340_s13  ;;  %s2479_s17 = smov (!%p2025_p0, %s364_s17), 15 }
  0x1d   : > { %s1706_s16 = smul.u32 3, %s356_s14  ;;  %s1913_s12 = smov 64  }
  0x1e   : > { %s2481_s17 = smov (!%p2025_p0, %s2479_s17), 15  ;;  %s1914_s14 = smov 32  }
  0x1f   : > { %s359_s26 = sadd.s32 %s1706_s16, %s2022_s15  ;;  %s1707_s16 = smul.u32 3, %s2481_s17 }
  0x20   : > { %s1452_s30 = sshll.u32 %s359_s26, 2 }
  0x21   : > { %s2034_s29 = scalar_lea.vmem %s2454_s1, %s1452_s30  ;;  %s373_s27 = sadd.s32 %s1707_s16, %s2022_s15 }
  0x22   : > { %v2038_v0 = vld [vmem:[%s2034_s29 + $0x48] sm:$0xff]   ;;  %v2041_v1 = vld [vmem:[%s2034_s29 + $0x50] ss:$0 sps:$4 sm:$0xff]   ;;  %v2045_v2 = vld [vmem:[%s2034_s29] sm:$0xff]   ;;  %s2087_s13 = scalar_select %p337_p2, %s2029_s8, 0 }
  0x23   : > { %v669_v3 = vrot.slane %v2038_v0, 1  ;;  %v670_v4 = vrot.slane %v2041_v1, 1  ;;  %v1786_v5 = vld [vmem:[%s2034_s29 + $0x8] ss:$0 sps:$4 sm:$0xff]   ;;  %v651_v6 = vrot.slane %v2045_v2, 1  ;;  %v2056_v7 = vld [vmem:[%s2034_s29 + $0xc] sm:$0xff]  }
  0x24   : > { %v652_v9 = vrot.slane %v1786_v5, 1  ;;  %v1788_v10 = vld [vmem:[%s2034_s29 + $0x14] ss:$0 sps:$4 sm:$0xff]   ;;  %v520_v11 = vshrl.u32 %v2045_v2, 16  ;;  %v522_v12 = vshll.u32 %v2045_v2, 16  ;;  %v654_v14 = vrot.slane %v2056_v7, 1 }
  0x25   : > { %v671_v8 = vsel %vm647_vm0, %v669_v3, %v670_v4  ;;  %v2063_v13 = vld [vmem:[%s2034_s29 + $0x54] sm:$0xff]   ;;  %v527_v15 = vshll.u32 %v1786_v5, 16  ;;  %v655_v17 = vrot.slane %v1788_v10, 1  ;;  %v1790_v19 = vld [vmem:[%s2034_s29 + $0x5c] ss:$0 sps:$4 sm:$0xff]   ;;  %v532_v23 = vshrl.u32 %v2056_v7, 16 }
  0x26   : > { %692 = vrot.lane.b32.xlu0 %v671_v8, %s1913_s12  ;;  %v653_v16 = vsel %vm647_vm0, %v651_v6, %v652_v9  ;;  %v524_v18 = vrot.slane %v522_v12, 1  ;;  %v604_v21 = vshrl.u32 %v2063_v13, 16  ;;  %v606_v22 = vshll.u32 %v2063_v13, 16  ;;  %v2077_v31 = vld [vmem:[%s2034_s29 + $0x18] sm:$0xff]   ;;  %v1792_v36 = vld [vmem:[%s2034_s29 + $0x20] ss:$0 sps:$4 sm:$0xff]  }
  0x27   : > { %680 = vrot.lane.b32.xlu1 %v653_v16, %s1913_s12  ;;  %v529_v20 = vrot.slane %v527_v15, 1  ;;  %v656_v24 = vsel %vm647_vm0, %v654_v14, %v655_v17  ;;  %v611_v26 = vshll.u32 %v1790_v19, 16  ;;  %v534_v27 = vshll.u32 %v2056_v7, 16  ;;  %s420_s26 = scalar_select %p419_p1, 1, 0  ;;  %v2101_v48 = vld [vmem:[%s2034_s29 + $0x24] sm:$0xff]  }
  0x28   : > { %v525_v25 = vor.u32 %v524_v18, %v520_v11  ;;  %v608_v28 = vrot.slane %v606_v22, 1  ;;  %v539_v29 = vshll.u32 %v1788_v10, 16  ;;  %v672_v30 = vrot.slane %v2063_v13, 1  ;;  %s1457_s17 = sshll.u32 %s373_s27, 2  ;;  %v2106_v53 = vld [vmem:[%s2034_s29 + $0x30] sm:$0xff]   ;;  %v2128_v14 = vld [vmem:[%s2034_s29 + $0x3c] sm:$0xff]  }
  0x29   : > { %v613_v33 = vrot.slane %v611_v26, 1  ;;  %v536_v34 = vrot.slane %v534_v27, 1  ;;  %v673_v35 = vrot.slane %v1790_v19, 1  ;;  %v592_v39 = vshrl.u32 %v2038_v0, 16  ;;  %s375_s10 = scalar_lea.vmem %s2455_s2, %s1457_s17  ;;  %v2114_v58 = vld [vmem:[%s2034_s29 + $0x2c] ss:$0 sps:$4 sm:$0xff]  }
  0x2a   : > { %v530_v32 = vsel %vm506_vm1, %v525_v25, %v529_v20  ;;  %v609_v37 = vor.u32 %v608_v28, %v604_v21  ;;  %v541_v38 = vrot.slane %v539_v29, 1  ;;  %v594_v40 = vshll.u32 %v2038_v0, 16  ;;  %v409_v61 = vld [vmem:[%s375_s10] sm:$0xf]  ;;  %v410_v62 = vld [vmem:[%s375_s10 + $0x4] sm:$0xf] }
  0x2b   : > { %682 = vrot.lane.b32.xlu1 %v656_v24, %s1913_s12  ;;  %629 = vrot.lane.b32.xlu0 %v530_v32, %s1914_s14  ;;  %v537_v41 = vor.u32 %v536_v34, %v532_v23  ;;  %v599_v42 = vshll.u32 %v2041_v1, 16  ;;  %v544_v43 = vshrl.u32 %v2077_v31, 16  ;;  %v546_v44 = vshll.u32 %v2077_v31, 16  ;;  %v411_v63 = vld [vmem:[%s375_s10 + $0x8] sm:$0xf]  ;;  %s2483_s13 = smov (!%p1445_p4, %s2087_s13), 15 }
  0x2c   : > { %v614_v45 = vsel %vm506_vm1, %v609_v37, %v613_v33  ;;  %v596_v46 = vrot.slane %v594_v40, 1  ;;  %v551_v47 = vshll.u32 %v1792_v36, 16  ;;  %v657_v52 = vrot.slane %v2077_v31, 1  ;;  %v1796_v12 = vld [vmem:[%s2034_s29 + $0x38] ss:$0 sps:$4 sm:$0xff]   ;;  %s1704_s8 = smul.u32 3, %s2483_s13 }
  0x2d   : > { %v542_v49 = vsel %vm506_vm1, %v537_v41, %v541_v38  ;;  %v601_v50 = vrot.slane %v599_v42, 1  ;;  %v548_v51 = vrot.slane %v546_v44, 1  ;;  %v658_v56 = vrot.slane %v1792_v36, 1  ;;  %v1798_v29 = vld [vmem:[%s2034_s29 + $0x44] ss:$0 sps:$4 sm:$0xff]   ;;  %s1524_s29 = sshll.u32 %s1899_s22, 5 }
  0x2e   : > { %v597_v54 = vor.u32 %v596_v46, %v592_v39  ;;  %v553_v55 = vrot.slane %v551_v47, 1  ;;  %v421_v57 = vstv %s420_s26  ;;  %v674_v59 = vsel %vm647_vm0, %v672_v30, %v673_v35  ;;  %s413_s16 = scalar_select %p412_p5, 1, 0 }
  0x2f   : > { %643 = vrot.lane.b32.xlu1 %v614_v45, %s1914_s14  ;;  %631 = vrot.lane.b32.xlu0 %v542_v49, %s1914_s14  ;;  %v549_v60 = vor.u32 %v548_v51, %v544_v43  ;;  %vm422_vm2 = vcmp.eq.s32.totalorder %v421_v57, 1  ;;  %v558_v3 = vshll.u32 %v2101_v48, 16  ;;  %v659_v8 = vsel %vm647_vm0, %v657_v52, %v658_v56  ;;  %s345_s26 = sadd.s32 %s2022_s15, %s1704_s8  ;;  %s332_s8 = sand.u32 1, %s1887_s19  }
  0x30   : > { %v602_v1 = vsel %vm506_vm1, %v597_v54, %v601_v50  ;;  %v423_v4 = vsel %vm422_vm2, %v409_v61, 0  ;;  %v424_v5 = vsel %vm422_vm2, %v410_v62, 0  ;;  %v425_v6 = vsel %vm422_vm2, %v411_v63, 0  ;;  %s1450_s27 = sshll.u32 %s345_s26, 2  ;;  %s2399_s30 = scalar_lea.sflag [#allocation3], %s332_s8 }
  0x31   : > { %v2123_v9 = vcombine.low %v423_v4, %v424_v5  ;;  %v1477_v10 = vcombine.low %v425_v6, %v425_v6  ;;  %v556_v11 = vshrl.u32 %v2101_v48, 16  ;;  %v554_v15 = vsel %vm506_vm1, %v549_v60, %v553_v55  ;;  %s347_s17 = scalar_lea.vmem %s2453_s0, %s1450_s27  ;;  %v1799_v6 = vld [vmem:[%s2456_s3 + $0x40] sm:$0xff]   ;;  %s1546_s27 = sshll.u32 %s1895_s21, 4 }
  0x32   : > { %v560_v16 = vrot.slane %v558_v3, 1  ;;  %v563_v17 = vshll.u32 %v2114_v58, 16  ;;  %v570_v18 = vshll.u32 %v2106_v53, 16  ;;  %v660_v24 = vrot.slane %v2101_v48, 1  ;;  %v406_v49 = vld [vmem:[%s347_s17] sm:$0xf]  ;;  %1594 = vmatprep.subr.bf16.mxu0 %v1799_v6  ;;  %1688 = vmatprep.subr.bf16.mxu1 %v1799_v6  ;;  %s1301_s21 = sadd.s32 %s1546_s27, %s1524_s29 }
  0x33   : > { %694 = vrot.lane.b32.xlu1 %v674_v59, %s1913_s12  ;;  %641 = vrot.lane.b32.xlu0 %v602_v1, %s1914_s14  ;;  %v616_v19 = vshrl.u32 %v2123_v9, 16  ;;  %v618_v20 = vshll.u32 %v2123_v9, 16  ;;  %v623_v21 = vshll.u32 %v1477_v10, 16  ;;  %v675_v22 = vrot.slane %v2123_v9, 1  ;;  %v407_v50 = vld [vmem:[%s347_s17 + $0x4] sm:$0xf] }
  0x34   : > { %v676_v23 = vrot.slane %v1477_v10, 1  ;;  %v661_v25 = vrot.slane %v2114_v58, 1  ;;  %v575_v28 = vshll.u32 %v1796_v12, 16  ;;  %v568_v32 = vshrl.u32 %v2106_v53, 16  ;;  %v408_v52 = vld [vmem:[%s347_s17 + $0x8] sm:$0xf] }
  0x35   : > { %v620_v26 = vrot.slane %v618_v20, 1  ;;  %v625_v27 = vrot.slane %v623_v21, 1  ;;  %v572_v33 = vrot.slane %v570_v18, 1  ;;  %v561_v35 = vor.u32 %v560_v16, %v556_v11  ;;  %v1801_v10 = vld [vmem:[%s2456_s3 + $0x48] sm:$0xff]   ;;  %v1803_v21 = vld [vmem:[%s2456_s3 + $0x50] sm:$0xff]   ;;  %s1915_s17 = smov 96  }
  0x36   : > { %v677_v30 = vsel %vm647_vm0, %v675_v22, %v676_v23  ;;  %v565_v36 = vrot.slane %v563_v17, 1  ;;  %v582_v37 = vshll.u32 %v2128_v14, 16  ;;  %v577_v38 = vrot.slane %v575_v28, 1  ;;  %v1802_v17 = vld [vmem:[%s2456_s3 + $0x8] sm:$0xff]   ;;  %v1804_v23 = vld [vmem:[%s2456_s3 + $0x10] sm:$0xff]   ;;  %v1808_v28 = vld [vmem:[%s2456_s3 + $0x20] sm:$0xff]  }
  0x37   : > { %633 = vrot.lane.b32.xlu0 %v554_v15, %s1914_s14  ;;  %684 = vrot.lane.b32.xlu1 %v659_v8, %s1913_s12  ;;  %v621_v34 = vor.u32 %v620_v26, %v616_v19  ;;  %v663_v39 = vrot.slane %v2106_v53, 1  ;;  %v664_v40 = vrot.slane %v1796_v12, 1  ;;  %v580_v42 = vshrl.u32 %v2128_v14, 16  ;;  %v1800_v8 = vld [vmem:[%s2456_s3] sm:$0xff]   ;;  %v1806_v26 = vld [vmem:[%s2456_s3 + $0x18] sm:$0xff]   ;;  %s1525_s22 = sshll.u32 %s1301_s21, 6 }
  0x38   : > { %v587_v43 = vshll.u32 %v1798_v29, 16  ;;  %v414_v44 = vstv %s413_s16  ;;  %v662_v45 = vsel %vm647_vm0, %v660_v24, %v661_v25  ;;  %v573_v46 = vor.u32 %v572_v33, %v568_v32  ;;  %1595 = vmatpush3.bf16.msra.mxu0 %v1800_v8  ;;  %1696 = vmatpush3.bf16.msra.mxu1 %v1800_v8  ;;  %v1805_v25 = vld [vmem:[%s2456_s3 + $0x58] sm:$0xff]   ;;  %v1811_v32 = vld [vmem:[%s2456_s3 + $0x70] sm:$0xff]   ;;  %s1442_s16 = sshll.u32 %s332_s8, 6  ;;  %s2390_s15 = scalar_lea.hbm %s2458_s5, %s1525_s22 }
  0x39   : > { %v626_v41 = vsel %vm506_vm1, %v621_v34, %v625_v27  ;;  %v584_v47 = vrot.slane %v582_v37, 1  ;;  %vm415_vm3 = vcmp.eq.s32.totalorder %v414_v44, 1  ;;  %v566_v51 = vsel %vm506_vm1, %v561_v35, %v565_v36  ;;  %1596 = vmatprep.subr.bf16.mxu0 %v1801_v10  ;;  %1689 = vmatprep.subr.bf16.mxu1 %v1801_v10  ;;  %v1807_v27 = vld [vmem:[%s2456_s3 + $0x60] sm:$0xff]   ;;  %v1812_v33 = vld [vmem:[%s2456_s3 + $0x30] sm:$0xff]   ;;  %v1813_v34 = vld [vmem:[%s2456_s3 + $0x78] sm:$0xff]   ;;  %s2363_s26 = scalar_lea.vmem [#allocation2], %s1442_s16 }
  0x3a   : > { %v416_v54 = vsel %vm415_vm3, %v406_v49, 0  ;;  %v417_v55 = vsel %vm415_vm3, %v407_v50, 0  ;;  %v418_v56 = vsel %vm415_vm3, %v408_v52, 0  ;;  %v665_v58 = vsel %vm647_vm0, %v663_v39, %v664_v40  ;;  %v1814_v35 = vld [vmem:[%s2456_s3 + $0x38] sm:$0xff]   ;;  %s1304_s13 = sshll.u32 %s2363_s26, 4  ;;  %s1916_s10 = smov [#allocation2]   ;;  %s2392_s13 = int_to_ptr.vmem [resolvable:$true] %s1304_s13 }
  0x3b   : > { %696 = vrot.lane.b32.xlu1 %v677_v30, %s1913_s12  ;;  %645 = vrot.lane.b32.xlu0 %v626_v41, %s1914_s14  ;;  %v2164_v57 = vcombine.low %v416_v54, %v417_v55  ;;  %v1468_v59 = vcombine.low %v418_v56, %v418_v56  ;;  %v578_v60 = vsel %vm506_vm1, %v573_v46, %v577_v38  ;;  %v666_v61 = vrot.slane %v2128_v14, 1  ;;  %v1810_v30 = vld [vmem:[%s2456_s3 + $0x28] sm:$0xff]   ;;  %v2235_v38 = vld [vmem:[%s2456_s3 + $0x80] sm:$0xff]   ;;  %s1817_s9 = scalar_lea.vmem %s2392_s13, 1024  ;;  %s1821_s16 = sshll.u32 %s1916_s10, 4  ;;  %s1822_s16 = int_to_ptr.vmem [resolvable:$false] %s1821_s16 }
  0x3c   : > { %v667_v62 = vrot.slane %v1798_v29, 1  ;;  %v585_v1 = vor.u32 %v584_v47, %v580_v42  ;;  %v589_v3 = vrot.slane %v587_v43, 1  ;;  %1597 = vmatpush3.bf16.msra.mxu0 %v1802_v17  ;;  %1697 = vmatpush3.bf16.msra.mxu1 %v1802_v17  ;;  %v1809_v29 = vld [vmem:[%s2456_s3 + $0x68] sm:$0xff]   ;;  %p1818_p6 = scmp.ne.s32.totalorder %s2392_s13, %s1817_s9  ;;  %s1823_s27 = scalar_lea.vmem %s1822_s16, 2048 }
  0x3d   : > { %v510_v63 = vshll.u32 %v2164_v57, 16  ;;  %v508_v4 = vshrl.u32 %v2164_v57, 16  ;;  %v515_v5 = vshll.u32 %v1468_v59, 16  ;;  %v648_v15 = vrot.slane %v2164_v57, 1  ;;  %1598 = vmatprep.subr.bf16.mxu0 %v1803_v21  ;;  %1690 = vmatprep.subr.bf16.mxu1 %v1803_v21  ;;  %p1824_p10 = scmp.lt.s32.totalorder %s2392_s13, %s1822_s16  ;;  %p1825_p11 = scmp.lt.s32.totalorder %s1823_s27, %s1817_s9 }
  0x3e   : > { %v668_v12 = vsel %vm647_vm0, %v666_v61, %v667_v62  ;;  %v649_v16 = vrot.slane %v1468_v59, 1  ;;  %v590_v18 = vsel %vm506_vm1, %v585_v1, %v589_v3  ;;  %p1819_p7 = pnand %p1818_p6, %p1999_p3 }
  0x3f   : > { %686 = vrot.lane.b32.xlu1 %v662_v45, %s1913_s12  ;;  %635 = vrot.lane.b32.xlu0 %v566_v51, %s1914_s14  ;;  %v512_v11 = vrot.slane %v510_v63, 1  ;;  %v517_v20 = vrot.slane %v515_v5, 1  ;;  %p1826_p12 = por %p1825_p11, %p1824_p10 }
  0x40   : > { %v650_v22 = vsel %vm647_vm0, %v648_v15, %v649_v16  ;;  %1599 = vmatpush3.bf16.msra.mxu0 %v1804_v23  ;;  %1698 = vmatpush3.bf16.msra.mxu1 %v1804_v23  ;;  %p1820_p9 = pneg %p1819_p7 }
  0x41   : > { %v513_v19 = vor.u32 %v512_v11, %v508_v4  ;;  %1600 = vmatprep.subr.bf16.mxu0 %v1805_v25  ;;  %1691 = vmatprep.subr.bf16.mxu1 %v1805_v25 }
  0x42   : > { %p1827_p13 = pnand %p1826_p12, %p1820_p9 }
  0x43   : > { %688 = vrot.lane.b32.xlu1 %v665_v58, %s1913_s12  ;;  %637 = vrot.lane.b32.xlu0 %v578_v60, %s1914_s14  ;;  %v518_v24 = vsel %vm506_vm1, %v513_v19, %v517_v20 }
  0x44   : > { %1601 = vmatpush3.bf16.msra.mxu0 %v1806_v26  ;;  %1699 = vmatpush3.bf16.msra.mxu1 %v1806_v26 }
  0x45   : > { %1602 = vmatprep.subr.bf16.mxu0 %v1807_v27  ;;  %1692 = vmatprep.subr.bf16.mxu1 %v1807_v27 }
  0x47   : > { %690 = vrot.lane.b32.xlu1 %v668_v12, %s1913_s12  ;;  %639 = vrot.lane.b32.xlu0 %v590_v18, %s1914_s14 }
  0x48   : > { %1603 = vmatpush3.bf16.msra.mxu0 %v1808_v28  ;;  %1700 = vmatpush3.bf16.msra.mxu1 %v1808_v28 }
  0x49   : > { %1604 = vmatprep.subr.bf16.mxu0 %v1809_v29  ;;  %1693 = vmatprep.subr.bf16.mxu1 %v1809_v29 }
  0x4b   : > { %678 = vrot.lane.b32.xlu1 %v650_v22, %s1913_s12  ;;  %627 = vrot.lane.b32.xlu0 %v518_v24, %s1914_s14 }
  0x4c   : > { %1605 = vmatpush3.bf16.msra.mxu0 %v1810_v30  ;;  %1701 = vmatpush3.bf16.msra.mxu1 %v1810_v30 }
  0x4d   : > { %1606 = vmatprep.subr.bf16.mxu0 %v1811_v32  ;;  %1694 = vmatprep.subr.bf16.mxu1 %v1811_v32 }
  0x50   : > { %1607 = vmatpush3.bf16.msra.mxu0 %v1812_v33  ;;  %1702 = vmatpush3.bf16.msra.mxu1 %v1812_v33 }
  0x51   : > { %1608 = vmatprep.subr.bf16.mxu0 %v1813_v34  ;;  %1695 = vmatprep.subr.bf16.mxu1 %v1813_v34 }
  0x54   : > { %1609 = vmatpush3.bf16.msra.mxu0 %v1814_v35  ;;  %1703 = vmatpush3.bf16.msra.mxu1 %v1814_v35 }
  0x55   : > { %1668 = vmatprep.subr.bf16.mxu1 %v2235_v38 }
  0x98   : > { %v693_v36 = vpop.permute.xlu0 %692 }
  0x99   : > { %v681_v37 = vpop.permute.xlu1 %680 }
  0x9d   : > { %v683_v39 = vpop.permute.xlu1 %682  ;;  %v630_v40 = vpop.permute.xlu0 %629 }
  0x9e   : > { %v702_v41 = vsel %vm698_vm4, %v2045_v2, %v630_v40 }
  0x9f   : > { %v2241_v42 = vsel %vm719_vm5, %v702_v41, %v681_v37 }
  0xa0   : > { %748 = vrot.lane.b32.xlu0 %v2241_v42, %s1915_s17 }
  0xa1   : > { %v644_v43 = vpop.permute.xlu1 %643  ;;  %v632_v44 = vpop.permute.xlu0 %631 }
  0xa2   : > { %v704_v45 = vsel %vm698_vm4, %v2056_v7, %v632_v44  ;;  %v716_v2 = vsel %vm698_vm4, %v2063_v13, %v644_v43 }
  0xa3   : > { %v2248_v46 = vsel %vm719_vm5, %v704_v45, %v683_v39 }
  0xa4   : > { %765 = vrot.lane.b32.xlu1 %v2248_v46, %s1913_s12 }
  0xa5   : > { %v695_v47 = vpop.permute.xlu1 %694  ;;  %v642_v49 = vpop.permute.xlu0 %641 }
  0xa6   : > { %v714_v50 = vsel %vm698_vm4, %v2038_v0, %v642_v49  ;;  %v737_v51 = vsel %vm719_vm5, %v716_v2, %v695_v47 }
  0xa7   : > { %v2258_v52 = vsel %vm719_vm5, %v714_v50, %v693_v36 }
  0xa8   : > { %777 = vrot.lane.b32.xlu1 %v737_v51, %s1913_s12  ;;  %760 = vrot.lane.b32.xlu0 %v2258_v52, %s1915_s17 }
  0xa9   : > { %v634_v7 = vpop.permute.xlu0 %633  ;;  %v685_v54 = vpop.permute.xlu1 %684 }
  0xaa   : > { %v706_v13 = vsel %vm698_vm4, %v2077_v31, %v634_v7 }
  0xab   : > { %v2266_v55 = vsel %vm719_vm5, %v706_v13, %v685_v54 }
  0xac   : > { %767 = vrot.lane.b32.xlu1 %v2266_v55, %s1913_s12  ;;  %750 = vrot.lane.b32.xlu0 %v2248_v46, %s1915_s17 }
  0xad   : > { %v697_v0 = vpop.permute.xlu1 %696  ;;  %v646_v56 = vpop.permute.xlu0 %645 }
  0xae   : > { %v718_v58 = vsel %vm698_vm4, %v2123_v9, %v646_v56 }
  0xaf   : > { %v739_v59 = vsel %vm719_vm5, %v718_v58, %v697_v0 }
  0xb0   : > { %762 = vrot.lane.b32.xlu0 %v737_v51, %s1915_s17  ;;  %779 = vrot.lane.b32.xlu1 %v739_v59, %s1913_s12 }
  0xb1   : > { %v687_v31 = vpop.permute.xlu1 %686  ;;  %v636_v60 = vpop.permute.xlu0 %635 }
  0xb2   : > { %v708_v61 = vsel %vm698_vm4, %v2101_v48, %v636_v60 }
  0xb3   : > { %v2280_v62 = vsel %vm719_vm5, %v708_v61, %v687_v31 }
  0xb4   : > { %752 = vrot.lane.b32.xlu0 %v2266_v55, %s1915_s17  ;;  %769 = vrot.lane.b32.xlu1 %v2280_v62, %s1913_s12 }
  0xb5   : > { %v689_v9 = vpop.permute.xlu1 %688  ;;  %v638_v63 = vpop.permute.xlu0 %637 }
  0xb6   : > { %v710_v1 = vsel %vm698_vm4, %v2106_v53, %v638_v63 }
  0xb7   : > { %v2289_v3 = vsel %vm719_vm5, %v710_v1, %v689_v9 }
  0xb8   : > { %754 = vrot.lane.b32.xlu0 %v2280_v62, %s1915_s17  ;;  %771 = vrot.lane.b32.xlu1 %v2289_v3, %s1913_s12 }
  0xb9   : > { %v691_v48 = vpop.permute.xlu1 %690  ;;  %v640_v4 = vpop.permute.xlu0 %639 }
  0xba   : > { %v712_v5 = vsel %vm698_vm4, %v2128_v14, %v640_v4 }
  0xbb   : > { %v733_v6 = vsel %vm719_vm5, %v712_v5, %v691_v48 }
  0xbc   : > { %756 = vrot.lane.b32.xlu0 %v2289_v3, %s1915_s17  ;;  %773 = vrot.lane.b32.xlu1 %v733_v6, %s1913_s12 }
  0xbd   : > { %v628_v53 = vpop.permute.xlu0 %627  ;;  %v679_v8 = vpop.permute.xlu1 %678 }
  0xbe   : > { %v700_v10 = vsel %vm698_vm4, %v2164_v57, %v628_v53  ;;  %v1816_v57 = vld [vmem:[%s2456_s3 + $0x88] sm:$0xff]  }
  0xbf   : > { %v721_v11 = vsel %vm719_vm5, %v700_v10, %v679_v8 }
  0xc0   : > { %775 = vrot.lane.b32.xlu0 %v2258_v52, %s1913_s12  ;;  %758 = vrot.lane.b32.xlu1 %v733_v6, %s1915_s17 }
 0x112   : > { %v749_v14 = vpop.permute.xlu0 %748 }
 0x113   : > { %v783_v16 = vsel %vm781_vm6, %v721_v11, %v749_v14 }
 0x116   : > { %v766_v12 = vpop.permute.xlu1 %765 }
 0x117   : > { %v807_v15 = vsel %vm719_vm5, %v749_v14, %v766_v12 }
 0x118   : > { %1029 = vmatprep.mubr.bf16.mxu0 %v807_v15 }
 0x119   : > { %1030 = vmatmul.mubr.bf16.vlgmr.msra.gmra.mrb[0].mxu0 %v783_v16 }
 0x11a   : > { %v778_v17 = vpop.permute.xlu1 %777  ;;  %v761_v18 = vpop.permute.xlu0 %760 }
 0x11b   : > { %v825_v19 = vsel %vm719_vm5, %v761_v18, %v778_v17  ;;  %v801_v20 = vsel %vm781_vm6, %v733_v6, %v761_v18  ;;  %v2352_v6 = vld [vmem:[%s2457_s4] ss:$0 sm:$0xff] }
 0x11c   : > { %1077 = vmatprep.mubr.bf16.mxu1 %v825_v19 }
 0x11d   : > { %1078 = vmatmul.mubr.bf16.vlgmr.msra.gmra.mrb[0].mxu1 %v801_v20 }
 0x11e   : > { %1669 = vmatpush3.bf16.msra.mxu1 %v2235_v38  ;;  %v768_v21 = vpop.permute.xlu1 %767  ;;  %v751_v22 = vpop.permute.xlu0 %750 }
 0x11f   : > { %v810_v23 = vsel %vm719_vm5, %v751_v22, %v768_v21  ;;  %v786_v24 = vsel %vm781_vm6, %v2241_v42, %v751_v22  ;;  %1670 = vmatprep.subr.bf16.mxu1 %v1816_v57 }
 0x120   : > { %1037 = vmatprep.mubr.bf16.mxu0 %v810_v23 }
 0x121   : > { %1038 = vmatmul.mubr.bf16.gmra.mrb[4].mxu0 %v786_v24 }
 0x122   : > { %v763_v25 = vpop.permute.xlu0 %762  ;;  %1671 = vmatpush3.bf16.msra.mxu1 %v1816_v57  ;;  %v780_v26 = vpop.permute.xlu1 %779 }
 0x123   : > { %v804_v27 = vsel %vm781_vm6, %v2258_v52, %v763_v25  ;;  %v828_v28 = vsel %vm719_vm5, %v763_v25, %v780_v26 }
 0x124   : > { %1085 = vmatprep.mubr.bf16.mxu1 %v828_v28 }
 0x125   : > { %1086 = vmatmul.mubr.bf16.gmra.mrb[4].mxu1 %v804_v27 }
 0x126   : > { %v753_v29 = vpop.permute.xlu0 %752  ;;  %v770_v30 = vpop.permute.xlu1 %769  ;;  %1672 = vmatprep.mubr.msk.bf16.mxu1 %vm698_vm4, %v766_v12 }
 0x127   : > { %v789_v32 = vsel %vm781_vm6, %v2248_v46, %v753_v29  ;;  %v813_v33 = vsel %vm719_vm5, %v753_v29, %v770_v30 }
 0x128   : > { %1045 = vmatprep.mubr.bf16.mxu0 %v813_v33 }
 0x129   : > { %1046 = vmatmul.mubr.bf16.gmra.mrb[8].mxu0 %v789_v32 }
 0x12a   : > { %v755_v34 = vpop.permute.xlu0 %754  ;;  %v772_v35 = vpop.permute.xlu1 %771 }
 0x12b   : > { %v816_v36 = vsel %vm719_vm5, %v755_v34, %v772_v35  ;;  %v792_v39 = vsel %vm781_vm6, %v2266_v55, %v755_v34 }
 0x12c   : > { %1053 = vmatprep.mubr.bf16.mxu0 %v816_v36 }
 0x12d   : > { %1673 = vmatmul.mubr.msk.bf16.vlgmr.msra.gmra.mrb[8].mxu1 %vm698_vm4, %v768_v21 }
 0x12e   : > { %v774_v37 = vpop.permute.xlu1 %773  ;;  %1676 = vmatprep.mubr.msk.bf16.mxu1 %vm698_vm4, %v770_v30  ;;  %v757_v38 = vpop.permute.xlu0 %756 }
 0x12f   : > { %v819_v40 = vsel %vm719_vm5, %v757_v38, %v774_v37  ;;  %v795_v43 = vsel %vm781_vm6, %v2280_v62, %v757_v38 }
 0x131   : > { %1054 = vmatmul.mubr.bf16.gmra.mrb[12].mxu0 %v792_v39 }
 0x132   : > { %1061 = vmatprep.mubr.bf16.mxu0 %v819_v40  ;;  %v759_v41 = vpop.permute.xlu1 %758  ;;  %v776_v42 = vpop.permute.xlu0 %775 }
 0x133   : > { %v822_v44 = vsel %vm719_vm5, %v759_v41, %v776_v42  ;;  %v798_v45 = vsel %vm781_vm6, %v2289_v3, %v759_v41 }
 0x135   : > { %1677 = vmatmul.mubr.msk.bf16.gmra.mrb[12].mxu1 %vm698_vm4, %v772_v35 }
 0x136   : > { %1680 = vmatprep.mubr.msk.bf16.mxu1 %vm698_vm4, %v774_v37 }
 0x139   : > { %1062 = vmatmul.mubr.bf16.gmra.mrb[16].mxu0 %v795_v43 }
 0x13a   : > { %1069 = vmatprep.mubr.bf16.mxu0 %v822_v44 }
 0x13d   : > { %1681 = vmatmul.mubr.msk.bf16.gmra.mrb[16].mxu1 %vm698_vm4, %v776_v42 }
 0x13e   : > { %1684 = vmatprep.mubr.msk.bf16.mxu1 %vm698_vm4, %v778_v17 }
 0x141   : > { %1070 = vmatmul.mubr.bf16.gmra.mrb[20].mxu0 %v798_v45 }
 0x145   : > { %1685 = vmatmul.mubr.msk.bf16.gmra.mrb[20].mxu1 %vm698_vm4, %v780_v26 }
 0x1ec   : > { %v1610_v46 = vpop.f32.mrb[0].mxu0 }
 0x1ed   : > { %v1611_v2 = vpop.f32.mrb[1].mxu0 }
 0x1ee   : > { %v1612_v47 = vadd.f32 %v1611_v2, %v1610_v46  ;;  %v1613_v49 = vpop.f32.mrb[2].mxu0 }
 0x1ef   : > { %v1614_v50 = vpop.f32.mrb[3].mxu0 }
 0x1f0   : > { %v1615_v51 = vadd.f32 %v1614_v50, %v1613_v49  ;;  %v1646_v52 = vpop.f32.mrb[0].mxu1  ;;  %v1032_v15 = vadd.f32 %v1612_v47, %v2352_v6 }
 0x1f1   : > { %v1647_v7 = vpop.f32.mrb[1].mxu1 }
 0x1f2   : > { %v2341_v54 = vadd.f32 %v1647_v7, %v1646_v52  ;;  %v1649_v13 = vpop.f32.mrb[2].mxu1  ;;  %v1035_v57 = vadd.f32 %v1615_v51, %v2352_v6 }
 0x1f3   : > { %v1650_v55 = vpop.f32.mrb[3].mxu1 }
 0x1f4   : > { %v2343_v0 = vadd.f32 %v1650_v55, %v1649_v13  ;;  %v1616_v56 = vpop.f32.mrb[4].mxu0 }
 0x1f5   : > { %v1617_v58 = vpop.f32.mrb[5].mxu0 }
 0x1f6   : > { %v1618_v59 = vadd.f32 %v1617_v58, %v1616_v56  ;;  %v1619_v31 = vpop.f32.mrb[6].mxu0 }
 0x1f7   : > { %v1620_v60 = vpop.f32.mrb[7].mxu0 }
 0x1f8   : > { %v1621_v61 = vadd.f32 %v1620_v60, %v1619_v31  ;;  %v1652_v62 = vpop.f32.mrb[4].mxu1  ;;  %v1040_v11 = vadd.f32 %v1618_v59, %v2352_v6 }
 0x1f9   : > { %v1653_v9 = vpop.f32.mrb[5].mxu1 }
 0x1fa   : > { %v2345_v63 = vadd.f32 %v1653_v9, %v1652_v62  ;;  %v1655_v1 = vpop.f32.mrb[6].mxu1  ;;  %v1043_v18 = vadd.f32 %v1621_v61, %v2352_v6 }
 0x1fb   : > { %v1656_v3 = vpop.f32.mrb[7].mxu1 }
 0x1fc   : > { %v2347_v48 = vadd.f32 %v1656_v3, %v1655_v1  ;;  %v1622_v4 = vpop.f32.mrb[8].mxu0 }
 0x1fd   : > { %v1623_v5 = vpop.f32.mrb[9].mxu0 }
 0x1fe   : > { %v1624_v53 = vadd.f32 %v1623_v5, %v1622_v4  ;;  %v1625_v8 = vpop.f32.mrb[10].mxu0 }
 0x1ff   : > { %v1626_v10 = vpop.f32.mrb[11].mxu0 }
 0x200   : > { %v1627_v14 = vadd.f32 %v1626_v10, %v1625_v8  ;;  %v1674_v12 = vpop.f32.mrb[8].mxu1  ;;  %v1048_v39 = vadd.f32 %v1624_v53, %v2352_v6 }
 0x201   : > { %v1137_v16 = vadd.f32 %v1674_v12, %v1040_v11  ;;  %v1128_v17 = vpop.f32.mrb[9].mxu1 }
 0x202   : > { %v1129_v19 = vadd.f32 %v1128_v17, %v1032_v15  ;;  %v1675_v20 = vpop.f32.mrb[10].mxu1  ;;  %v1051_v45 = vadd.f32 %v1627_v14, %v2352_v6  ;;  %v1088_v17 = vadd.f32 %v2345_v63, %v2352_v6 }
 0x203   : > { %v1140_v21 = vadd.f32 %v1675_v20, %v1043_v18  ;;  %v1131_v22 = vpop.f32.mrb[11].mxu1  ;;  %v1193_v25 = vmax.f32 %v1137_v16, 0.0 }
 0x204   : > { %v1132_v23 = vadd.f32 %v1131_v22, %v1035_v57  ;;  %v1628_v24 = vpop.f32.mrb[12].mxu0  ;;  %v1191_v28 = vmax.f32 %v1129_v19, 0.0 }
 0x205   : > { %v1194_v26 = vmax.f32 %v1140_v21, 0.0  ;;  %v1629_v27 = vpop.f32.mrb[13].mxu0  ;;  %v1080_v21 = vadd.f32 %v2341_v54, %v2352_v6 }
 0x206   : > { %v1192_v29 = vmax.f32 %v1132_v23, 0.0  ;;  %v1630_v30 = vadd.f32 %v1629_v27, %v1628_v24  ;;  %v1631_v32 = vpop.f32.mrb[14].mxu0  ;;  %v1091_v24 = vadd.f32 %v2347_v48, %v2352_v6 }
 0x207   : > { %v1555_v33 = vpack.c.bf16 %v1194_v26, %v1193_v25  ;;  %v1632_v34 = vpop.f32.mrb[15].mxu0 }
 0x208   : > { %v1550_v35 = vpack.c.bf16 %v1192_v29, %v1191_v28  ;;  %v1633_v36 = vadd.f32 %v1632_v34, %v1631_v32  ;;  %v1056_v37 = vadd.f32 %v1630_v30, %v2352_v6  ;;  %v1678_v38 = vpop.f32.mrb[12].mxu1  ;;  %v1083_v28 = vadd.f32 %v2343_v0, %v2352_v6 }
 0x209   : > { %1587 = vst [vmem:[%s2363_s26 + $0x8] sm:$0xff] %v1555_v33   ;;  %v1144_v40 = vpop.f32.mrb[13].mxu1 }
 0x20a   : > { %1551 = vst [vmem:[%s2363_s26] sm:$0xff] %v1550_v35   ;;  %v1153_v41 = vadd.f32 %v1678_v38, %v1056_v37  ;;  %v1145_v42 = vadd.f32 %v1144_v40, %v1048_v39  ;;  %v1059_v43 = vadd.f32 %v1633_v36, %v2352_v6  ;;  %v1679_v44 = vpop.f32.mrb[14].mxu1 }
 0x20b   : > { %v1147_v46 = vpop.f32.mrb[15].mxu1 }
 0x20c   : > { %v1156_v2 = vadd.f32 %v1679_v44, %v1059_v43  ;;  %v1148_v47 = vadd.f32 %v1147_v46, %v1051_v45  ;;  %v1634_v49 = vpop.f32.mrb[16].mxu0  ;;  %v1197_v50 = vmax.f32 %v1153_v41, 0.0  ;;  %v1195_v52 = vmax.f32 %v1145_v42, 0.0 }
 0x20d   : > { %v1635_v51 = vpop.f32.mrb[17].mxu0 }
 0x20e   : > { %v1198_v7 = vmax.f32 %v1156_v2, 0.0  ;;  %v1196_v13 = vmax.f32 %v1148_v47, 0.0  ;;  %v1636_v55 = vadd.f32 %v1635_v51, %v1634_v49  ;;  %v1637_v56 = vpop.f32.mrb[18].mxu0 }
 0x20f   : > { %v1638_v58 = vpop.f32.mrb[19].mxu0 }
 0x210   : > { %v1565_v59 = vpack.c.bf16 %v1198_v7, %v1197_v50  ;;  %v1560_v31 = vpack.c.bf16 %v1196_v13, %v1195_v52  ;;  %v1639_v60 = vadd.f32 %v1638_v58, %v1637_v56  ;;  %v1682_v61 = vpop.f32.mrb[16].mxu1  ;;  %v1064_v62 = vadd.f32 %v1636_v55, %v2352_v6 }
 0x211   : > { %v1160_v9 = vpop.f32.mrb[17].mxu1 }
 0x212   : > { %1589 = vst [vmem:[%s2363_s26 + $0x18] sm:$0xff] %v1565_v59   ;;  %1588 = vst [vmem:[%s2363_s26 + $0x10] sm:$0xff] %v1560_v31   ;;  %v1161_v1 = vadd.f32 %v1160_v9, %v1064_v62  ;;  %v1683_v3 = vpop.f32.mrb[18].mxu1  ;;  %v1067_v4 = vadd.f32 %v1639_v60, %v2352_v6 }
 0x213   : > { %v1163_v5 = vpop.f32.mrb[19].mxu1 }
 0x214   : > { %v1164_v53 = vadd.f32 %v1163_v5, %v1067_v4  ;;  %v1640_v8 = vpop.f32.mrb[20].mxu0  ;;  %v1199_v11 = vmax.f32 %v1161_v1, 0.0 }
 0x215   : > { %v1641_v10 = vpop.f32.mrb[21].mxu0 }
 0x216   : > { %v1200_v14 = vmax.f32 %v1164_v53, 0.0  ;;  %v1642_v12 = vadd.f32 %v1641_v10, %v1640_v8  ;;  %v1643_v15 = vpop.f32.mrb[22].mxu0 }
 0x217   : > { %v1644_v16 = vpop.f32.mrb[23].mxu0 }
 0x218   : > { %v1570_v18 = vpack.c.bf16 %v1200_v14, %v1199_v11  ;;  %v1072_v19 = vadd.f32 %v1642_v12, %v2352_v6  ;;  %v1645_v20 = vadd.f32 %v1644_v16, %v1643_v15  ;;  %v1686_v57 = vpop.f32.mrb[20].mxu1 }
 0x219   : > { %v1185_v22 = vadd.f32 %v1686_v57, %v1088_v17  ;;  %v1176_v23 = vpop.f32.mrb[21].mxu1 }
 0x21a   : > { %1590 = vst [vmem:[%s2363_s26 + $0x20] sm:$0xff] %v1570_v18   ;;  %v1169_v25 = vadd.f32 %v1682_v61, %v1072_v19  ;;  %v1075_v26 = vadd.f32 %v1645_v20, %v2352_v6  ;;  %v1177_v63 = vadd.f32 %v1176_v23, %v1080_v21  ;;  %v1687_v27 = vpop.f32.mrb[22].mxu1 }
 0x21b   : > { %v1188_v29 = vadd.f32 %v1687_v27, %v1091_v24  ;;  %v1179_v30 = vpop.f32.mrb[23].mxu1  ;;  %v1205_v48 = vmax.f32 %v1185_v22, 0.0 }
 0x21c   : > { %v1172_v54 = vadd.f32 %v1683_v3, %v1075_v26  ;;  %v1180_v32 = vadd.f32 %v1179_v30, %v1083_v28  ;;  %v1201_v34 = vmax.f32 %v1169_v25, 0.0  ;;  %v1203_v36 = vmax.f32 %v1177_v63, 0.0 }
 0x21d   : > { %v1206_v33 = vmax.f32 %v1188_v29, 0.0 }
 0x21e   : > { %v1202_v35 = vmax.f32 %v1172_v54, 0.0  ;;  %v1204_v37 = vmax.f32 %v1180_v32, 0.0 }
 0x21f   : > { %v1585_v38 = vpack.c.bf16 %v1206_v33, %v1205_v48 }
 0x220   : > { %v1575_v0 = vpack.c.bf16 %v1202_v35, %v1201_v34  ;;  %v1580_v6 = vpack.c.bf16 %v1204_v37, %v1203_v36 }
 0x221   : > { %1593 = vst [vmem:[%s2363_s26 + $0x38] sm:$0xff] %v1585_v38  }
 0x222   : > { %1591 = vst [vmem:[%s2363_s26 + $0x28] sm:$0xff] %v1575_v0   ;;  %1592 = vst [vmem:[%s2363_s26 + $0x30] sm:$0xff] %v1580_v6  }
 0x223   : > { %1830 = shalt.err (!%p1827_p13)
}
 0x224   : > { %s1831_s8 = scalar_lea.hbm %s2390_s15, 1024  ;;  %s1835_s21 = scalar_lea.hbm %s2458_s5, 4096 }
 0x225   : > { %p1832_p0 = scmp.ne.s32.totalorder %s2390_s15, %s1831_s8  ;;  %p1836_p4 = scmp.lt.u32.totalorder %s2390_s15, %s2458_s5 }
 0x226   : > { %p1837_p5 = scmp.lt.u32.totalorder %s1835_s21, %s1831_s8  ;;  %p1839_p7 = scmp.lt.u32.totalorder %s1831_s8, %s2390_s15 }
 0x227   : > { %p1833_p1 = pnand %p1832_p0, %p1999_p3 }
 0x228   : > { %p1838_p6 = por %p1837_p5, %p1836_p4 }
 0x229   : > { %p1834_p2 = pneg %p1833_p1 }
 0x22a   : > { %p1840_p9 = por %p1839_p7, %p1838_p6 }
 0x22c   : > { %p1841_p10 = pnand %p1840_p9, %p1834_p2 }
 0x22e   : > { %1844 = shalt.err (!%p1841_p10)
}
 0x22f   : > { %s1917_s17 = smov 4  }
 0x230   : > { %1708 = dma.vmem_to_hbm [thread:$0]  (%p1999_p3), %s2392_s13, 1024, %s2390_s15, %s2399_s30, %s1913_s12, %s1913_s12, %s1917_s17  }
 0x231 PF: > { %p1714_p11 = scmp.ge.s32.totalorder %s1911_s25, 2  ;;  %s1319_s9 = sand.u32 1, %s1883_s18  }
 0x232   : > { %s1320_s10 = scalar_lea.sflag [#allocation3], %s1319_s9 }
 0x233   : > { %p1711_p12 = pnand %p1714_p11, %p2008_p8 }
 0x235   : > { %1878 = dma.done.wait (!%p1711_p12), %s1320_s10, 1024  }
 0x236   : > { %1880 = vsyncadd (!%p1711_p12), %s1320_s10, 4294966272  ;;  %s18_s25 = sadd.s32 1, %s1911_s25   ;;  %s2464_s6 = sld [smem:[#allocation5_spill]] }
 0x237   : > { %p15_p13 = scmp.ge.s32.totalorder %s18_s25, 6   ;;  %s2465_s18 = smov %s1887_s19 }
 0x238   : > { %s2466_s19 = smov %s1891_s20  ;;  %s2467_s20 = smov %s2017_s11 }
 0x239   : > { %s2468_s21 = smov %s1903_s23  ;;  %s2469_s22 = smov %s1907_s24 }
 0x23a   : > { %s2470_s23 = smov %s2473_s28  ;;  %17 = sbr.rel (!%p15_p13) target bundleno = 5 (0x5), region = 81 }
 0x23c   : > { %s2471_s24 = smov %s2464_s6 }
 0x241   :  { %1325 = vsyncpa [#allocation3], 1 }
 0x242   :  { %1327 = vsyncpa [#allocation3 + $0x1], 1 }

</bundles_post_ra>
